<compile_context>
chip_gen: v7x
topology: tpu7x:2x2x1
jax: 0.10.0
libtpu: 0.0.40
codegen_flags: <defaults>
</compile_context>

<pallas_src>
import jax
import jax.numpy as jnp
from jax.experimental import pallas as pl
from jax.experimental.pallas import tpu as pltpu


def manager_fwd_kernel(adj_ref, feat_ref, w_arch_ref, b_arch_ref,
                       w_pred_ref, b_pred_ref, logits_ref):
    # Backbone GCN layer on one row-tile of the graph, associativity-optimized:
    #   ax = A_tile @ X                 (tm, f_in)  -- per-tile work only
    #   h  = relu(ax @ W_a + b_a)       (tm, hidden)
    ax = jnp.dot(adj_ref[...], feat_ref[...],
                 preferred_element_type=jnp.float32)            # bf16 x bf16 -> f32
    h = jnp.dot(ax.astype(jnp.bfloat16), w_arch_ref[...],
                preferred_element_type=jnp.float32)             # bf16 x bf16 -> f32
    h = jnp.maximum(h + b_arch_ref[...], 0.0)                   # f32 elementwise
    # Prediction head: logits_tile = h @ W_p + b_p  (W_p pre-transposed & 128-padded)
    logits_ref[...] = (jnp.dot(h.astype(jnp.bfloat16), w_pred_ref[...],
                               preferred_element_type=jnp.float32)
                       + b_pred_ref[...])


def manager_forward(adj, features, w_arch, b_arch, w_pred, b_pred, *, tm=128):
    n_nodes, f_in = features.shape
    hidden = w_arch.shape[1]
    n_class = w_pred.shape[1]
    assert adj.shape == (n_nodes, n_nodes)
    assert w_arch.shape == (f_in, hidden)
    assert b_arch.shape == (1, hidden)
    assert w_pred.shape == (hidden, n_class)
    assert b_pred.shape == (1, n_class)

    # Row tile: largest power-of-two <= tm that divides n_nodes; fall back to a
    # single full-extent block if n_nodes has no clean divisor (always legal).
    tm = min(tm, n_nodes)
    while tm > 8 and n_nodes % tm:
        tm //= 2
    if n_nodes % tm:
        tm = n_nodes

    # Lane-dense output: pad class dim to a multiple of 128 with zero columns.
    nc_pad = ((n_class + 127) // 128) * 128
    w_pred_p = jnp.zeros((hidden, nc_pad), jnp.float32).at[:, :n_class].set(
        w_pred.astype(jnp.float32))
    b_pred_p = jnp.zeros((1, nc_pad), jnp.float32).at[:, :n_class].set(
        b_pred.astype(jnp.float32))

    # bf16 MXU inputs, f32 biases (accumulation & elementwise stay f32).
    adj_b = adj.astype(jnp.bfloat16)
    feat_b = features.astype(jnp.bfloat16)
    w_arch_b = w_arch.astype(jnp.bfloat16)
    w_pred_b = w_pred_p.astype(jnp.bfloat16)
    b_arch_f = b_arch.astype(jnp.float32)

    grid = (n_nodes // tm,)
    grid_spec = pltpu.PrefetchScalarGridSpec(
        num_scalar_prefetch=0,
        grid=grid,
        in_specs=[
            pl.BlockSpec((tm, n_nodes), lambda i: (i, 0)),     # adj row tile (streamed)
            pl.BlockSpec((n_nodes, f_in), lambda i: (0, 0)),   # features (DMA'd once)
            pl.BlockSpec((f_in, hidden), lambda i: (0, 0)),    # W_arch
            pl.BlockSpec((1, hidden), lambda i: (0, 0)),       # b_arch
            pl.BlockSpec((hidden, nc_pad), lambda i: (0, 0)),  # W_pred (128-padded)
            pl.BlockSpec((1, nc_pad), lambda i: (0, 0)),       # b_pred (128-padded)
        ],
        out_specs=pl.BlockSpec((tm, nc_pad), lambda i: (i, 0)),
    )
    logits_p = pl.pallas_call(
        manager_fwd_kernel,
        out_shape=jax.ShapeDtypeStruct((n_nodes, nc_pad), jnp.float32),
        grid_spec=grid_spec,
        compiler_params=pltpu.CompilerParams(
            dimension_semantics=("parallel",),   # shard row tiles across v7x cores
        ),
    )(adj_b, feat_b, w_arch_b, b_arch_f, w_pred_b, b_pred_p)
    return logits_p[:, :n_class]


if __name__ == "__main__":
    # Small, TPU-friendly shapes consistent with the module:
    #   in_feat = 32 (backbone output dim), taskcla (n_class) = 16, 256 graph nodes
    #   (256 nodes so the row-tiled grid actually runs >1 step).
    n_nodes, f_in, in_feat, n_class = 256, 32, 32, 16

    key = jax.random.PRNGKey(0)
    k_adj, k_feat, k_wa, k_ba, k_wp, k_bp = jax.random.split(key, 6)

    # Deterministic symmetric row-normalized adjacency (self-loops included).
    a = (jax.random.uniform(k_adj, (n_nodes, n_nodes)) > 0.9).astype(jnp.float32)
    a = jnp.maximum(a, a.T) + jnp.eye(n_nodes, dtype=jnp.float32)
    adj = a / jnp.sum(a, axis=1, keepdims=True)

    features = jax.random.normal(k_feat, (n_nodes, f_in), dtype=jnp.float32)

    # Backbone GCN weights (arch): Linear(f_in -> in_feat)
    lim_a = 1.0 / jnp.sqrt(jnp.float32(f_in))
    w_arch = jax.random.uniform(k_wa, (f_in, in_feat), minval=-lim_a, maxval=lim_a)
    b_arch = jax.random.uniform(k_ba, (1, in_feat), minval=-lim_a, maxval=lim_a)

    # Prediction head: nn.Linear(in_feat, n_class) — stored transposed for h @ W.
    lim_p = 1.0 / jnp.sqrt(jnp.float32(in_feat))
    w_pred = jax.random.uniform(k_wp, (in_feat, n_class), minval=-lim_p, maxval=lim_p)
    b_pred = jax.random.uniform(k_bp, (1, n_class), minval=-lim_p, maxval=lim_p)

    logits = manager_forward(adj, features, w_arch, b_arch, w_pred, b_pred)
    jax.block_until_ready(logits)
    assert logits.shape == (n_nodes, n_class)

    # Reference 1: mirror the kernel's bf16-input / f32-accumulate arithmetic
    # (same associativity: (A @ X) @ W_arch).
    adj_b = adj.astype(jnp.bfloat16)
    feat_b = features.astype(jnp.bfloat16)
    w_arch_b = w_arch.astype(jnp.bfloat16)
    w_pred_b = w_pred.astype(jnp.bfloat16)
    ax_ref = jnp.dot(adj_b, feat_b,
                     preferred_element_type=jnp.float32).astype(jnp.bfloat16)
    h_ref = jnp.maximum(jnp.dot(ax_ref, w_arch_b,
                                preferred_element_type=jnp.float32) + b_arch, 0.0)
    logits_bf16_ref = (jnp.dot(h_ref.astype(jnp.bfloat16), w_pred_b,
                               preferred_element_type=jnp.float32) + b_pred)
    assert jnp.allclose(logits, logits_bf16_ref, rtol=1e-3, atol=1e-3)

    # Reference 2: full-precision spec check (loose tolerance for bf16 inputs).
    h_f32 = jnp.maximum(adj @ (features @ w_arch) + b_arch, 0.0)
    logits_f32_ref = h_f32 @ w_pred + b_pred
    assert jnp.allclose(logits, logits_f32_ref, rtol=5e-2, atol=5e-2)

    print("KERNEL_OK")
</pallas_src>

<mosaic_0001>
module attributes {stable_mosaic.version = 11 : i64} {
  func.func @manager_fwd_kernel(%arg0: i32, %arg1: memref<128x256xbf16, #tpu.memory_space<vmem>>, %arg2: memref<256x32xbf16, #tpu.memory_space<vmem>>, %arg3: memref<32x32xbf16, #tpu.memory_space<vmem>>, %arg4: memref<1x32xf32, #tpu.memory_space<vmem>>, %arg5: memref<32x128xbf16, #tpu.memory_space<vmem>>, %arg6: memref<1x128xf32, #tpu.memory_space<vmem>>, %arg7: memref<128x128xf32, #tpu.memory_space<vmem>>) attributes {dimension_semantics = [#tpu.dimension_semantics<parallel>], iteration_bounds = array<i64: 2>, scalar_prefetch = 0 : i64, scratch_operands = 0 : i64, tpu.core_type = #tpu.core_type<tc>, window_params = [{transform_indices = @transform_0, window_bounds = array<i64: 128, 256>}, {pipeline_mode = #tpu.pipeline_mode<synchronous>, transform_indices = @transform_1, window_bounds = array<i64: 256, 32>}, {pipeline_mode = #tpu.pipeline_mode<synchronous>, transform_indices = @transform_2, window_bounds = array<i64: 32, 32>}, {pipeline_mode = #tpu.pipeline_mode<synchronous>, transform_indices = @transform_3, window_bounds = array<i64: 1, 32>}, {pipeline_mode = #tpu.pipeline_mode<synchronous>, transform_indices = @transform_4, window_bounds = array<i64: 32, 128>}, {pipeline_mode = #tpu.pipeline_mode<synchronous>, transform_indices = @transform_5, window_bounds = array<i64: 1, 128>}, {transform_indices = @transform_6, window_bounds = array<i64: 128, 128>}]} {
    %c0 = arith.constant 0 : index
    %c0_0 = arith.constant 0 : index
    %0 = vector.load %arg1[%c0, %c0_0] : memref<128x256xbf16, #tpu.memory_space<vmem>>, vector<128x256xbf16>
    %c0_1 = arith.constant 0 : index
    %c0_2 = arith.constant 0 : index
    %1 = vector.load %arg2[%c0_1, %c0_2] : memref<256x32xbf16, #tpu.memory_space<vmem>>, vector<256x32xbf16>
    %cst = arith.constant dense<0.000000e+00> : vector<128x32xf32>
    %2 = tpu.matmul %0, %1, %cst {dimension_numbers = #tpu.dot_dimension_numbers<[1], [0], [0], [1], [0, 0, 1, 1], [], []>} : vector<128x256xbf16>, vector<256x32xbf16>, vector<128x32xf32> -> vector<128x32xf32>
    %3 = arith.truncf %2 : vector<128x32xf32> to vector<128x32xbf16>
    %c0_3 = arith.constant 0 : index
    %c0_4 = arith.constant 0 : index
    %4 = vector.load %arg3[%c0_3, %c0_4] : memref<32x32xbf16, #tpu.memory_space<vmem>>, vector<32x32xbf16>
    %cst_5 = arith.constant dense<0.000000e+00> : vector<128x32xf32>
    %5 = tpu.matmul %3, %4, %cst_5 {dimension_numbers = #tpu.dot_dimension_numbers<[1], [0], [0], [1], [0, 0, 1, 1], [], []>} : vector<128x32xbf16>, vector<32x32xbf16>, vector<128x32xf32> -> vector<128x32xf32>
    %c0_6 = arith.constant 0 : index
    %c0_7 = arith.constant 0 : index
    %6 = vector.load %arg4[%c0_6, %c0_7] : memref<1x32xf32, #tpu.memory_space<vmem>>, vector<1x32xf32>
    %7 = vector.broadcast %6 : vector<1x32xf32> to vector<128x32xf32>
    %8 = arith.addf %5, %7 : vector<128x32xf32>
    %cst_8 = arith.constant 0.000000e+00 : f32
    %9 = vector.broadcast %cst_8 : f32 to vector<128x32xf32>
    %10 = arith.maximumf %8, %9 : vector<128x32xf32>
    %11 = arith.truncf %10 : vector<128x32xf32> to vector<128x32xbf16>
    %c0_9 = arith.constant 0 : index
    %c0_10 = arith.constant 0 : index
    %12 = vector.load %arg5[%c0_9, %c0_10] : memref<32x128xbf16, #tpu.memory_space<vmem>>, vector<32x128xbf16>
    %cst_11 = arith.constant dense<0.000000e+00> : vector<128x128xf32>
    %13 = tpu.matmul %11, %12, %cst_11 {dimension_numbers = #tpu.dot_dimension_numbers<[1], [0], [0], [1], [0, 0, 1, 1], [], []>} : vector<128x32xbf16>, vector<32x128xbf16>, vector<128x128xf32> -> vector<128x128xf32>
    %c0_12 = arith.constant 0 : index
    %c0_13 = arith.constant 0 : index
    %14 = vector.load %arg6[%c0_12, %c0_13] : memref<1x128xf32, #tpu.memory_space<vmem>>, vector<1x128xf32>
    %15 = vector.broadcast %14 : vector<1x128xf32> to vector<128x128xf32>
    %16 = arith.addf %13, %15 : vector<128x128xf32>
    %c0_14 = arith.constant 0 : index
    %c0_15 = arith.constant 0 : index
    %17 = vector.load %arg7[%c0_14, %c0_15] : memref<128x128xf32, #tpu.memory_space<vmem>>, vector<128x128xf32>
    tpu.vector_store %arg7[%c0_14, %c0_15], %16 {strides = array<i32>} : memref<128x128xf32, #tpu.memory_space<vmem>>, vector<128x128xf32>,
    return
  }
  func.func @transform_0(%arg0: i32) -> (i32, i32) {
    %c0_i32 = arith.constant 0 : i32
    %c0_i32_0 = arith.constant 0 : i32
    return %arg0, %c0_i32 : i32, i32
  }
  func.func @transform_1(%arg0: i32) -> (i32, i32) {
    %c0_i32 = arith.constant 0 : i32
    %c0_i32_0 = arith.constant 0 : i32
    %c0_i32_1 = arith.constant 0 : i32
    return %c0_i32, %c0_i32_0 : i32, i32
  }
  func.func @transform_2(%arg0: i32) -> (i32, i32) {
    %c0_i32 = arith.constant 0 : i32
    %c0_i32_0 = arith.constant 0 : i32
    %c0_i32_1 = arith.constant 0 : i32
    return %c0_i32, %c0_i32_0 : i32, i32
  }
  func.func @transform_3(%arg0: i32) -> (i32, i32) {
    %c0_i32 = arith.constant 0 : i32
    %c0_i32_0 = arith.constant 0 : i32
    %c0_i32_1 = arith.constant 0 : i32
    return %c0_i32, %c0_i32_0 : i32, i32
  }
  func.func @transform_4(%arg0: i32) -> (i32, i32) {
    %c0_i32 = arith.constant 0 : i32
    %c0_i32_0 = arith.constant 0 : i32
    %c0_i32_1 = arith.constant 0 : i32
    return %c0_i32, %c0_i32_0 : i32, i32
  }
  func.func @transform_5(%arg0: i32) -> (i32, i32) {
    %c0_i32 = arith.constant 0 : i32
    %c0_i32_0 = arith.constant 0 : i32
    %c0_i32_1 = arith.constant 0 : i32
    return %c0_i32, %c0_i32_0 : i32, i32
  }
  func.func @transform_6(%arg0: i32) -> (i32, i32) {
    %c0_i32 = arith.constant 0 : i32
    %c0_i32_0 = arith.constant 0 : i32
    return %arg0, %c0_i32 : i32, i32
  }
}

</mosaic_0001>

<bundles_post_ra>
// kernel: tpu_custom_call.1
= control target key start
LH: loop header
LB: loop body
LE: loop exit
PB: predicated region body
PF: predicated region fallthrough
CT: control target
= control target key end

     0   :  { %11 = vsyncpa [#allocation3], 0  ;;  %s1733_s0 = inlined_call_operand.hbm [shape: bf16[256,256], index: 0, kind: input, shape index: {}]   ;;  %s1734_s1 = inlined_call_operand.vmem [shape: bf16[256,32], index: 1, kind: input, shape index: {}]   ;;  %s1735_s2 = inlined_call_operand.vmem [shape: bf16[32,32], index: 2, kind: input, shape index: {}]   ;;  %s1736_s3 = inlined_call_operand.vmem [shape: f32[1,32], index: 3, kind: input, shape index: {}]   ;;  %s1737_s4 = inlined_call_operand.vmem [shape: bf16[32,128], index: 4, kind: input, shape index: {}]   ;;  %s1738_s5 = inlined_call_operand.vmem [shape: f32[1,128], index: 5, kind: input, shape index: {}]   ;;  %s1739_s6 = inlined_call_operand.hbm [shape: f32[256,128], index: 6, kind: output, shape index: {}]  }
   0x1   :  { %13 = vsyncpa [#allocation3 + $0x1], 0 }
   0x2   :  { %14 = vsyncpa [#allocation4], 0 }
   0x3   :  { %16 = vsyncpa [#allocation4 + $0x1], 0  ;;  %s1448_s21 = smov 0   ;;  %s1450_s22 = smov 0  }
   0x4   :  { %s1452_s23 = smov 0   ;;  %s1454_s24 = smov 0  }
   0x5 LB: > { %s1469_s25 = sadd.s32 4294967295, %s1405_s24   ;;  %s1019_s26 = sadd.s32 4294967294, %s1405_s24   ;;  %s1405_s24 = sphi %s1454_s24, %s1752_s24   ;;  %s1401_s23 = sphi %s1452_s23, %s1751_s23   ;;  %s1397_s22 = sphi %s1450_s22, %s1750_s22   ;;  %s1393_s21 = sphi %s1448_s21, %s1749_s21  }
   0x6   : > { %s1473_s27 = sadd.s32 1, %s1405_s24   ;;  %s29_s28 = sadd.s32 1, %s1401_s23 }
   0x7   : > { %s26_s29 = ssub.s32 %s1405_s24, %s1473_s27  ;;  %p36_p0 = scmp.ne.s32.totalorder %s1401_s23, %s1397_s22 }
   0x8   : > { %p27_p1 = scmp.eq.s32.totalorder %s26_s29, 0  ;;  %p37_p2 = scmp.eq.s32.totalorder %s1405_s24, 0 }
   0x9   : > { %p42_p3 = scmp.ne.s32.totalorder %s1397_s22, %s1393_s21  ;;  %p43_p4 = scmp.eq.s32.totalorder %s1469_s25, 0 }
   0xa   : > { %s1485_s30 = scalar_select %p27_p1, %s1401_s23, %s29_s28  }
   0xb   : > { %p1487_p5 = por %p37_p2, %p36_p0  ;;  %p1491_p6 = por %p43_p4, %p42_p3 }
   0xc   : > { %p171_p7 = scmp.eq.s32.totalorder %s1469_s25, 1  ;;  %p177_p8 = scmp.eq.s32.totalorder %s1019_s26, 1 }
   0xd   : > { %p1227_p10 = scmp.lt.s32.totalorder %s1405_s24, 2  ;;  %s212_s11 = sand.u32 1, %s1401_s23  }
   0xe   : > { %p1498_p11 = por %p171_p7, %p36_p0  ;;  %p1502_p12 = por %p177_p8, %p42_p3 }
   0xf   : > { %s1089_s12 = sshll.u32 %s1405_s24, 11  ;;  %s1022_s13 = sshll.u32 %s212_s11, 7 }
  0x10   : > { %s1743_s9 = scalar_select %p1498_p11, 1, 0 }
  0x11   : > { %s1744_s10 = scalar_select %p1502_p12, 1, 0 }
  0x12   : > { %s1511_s16 = scalar_lea.hbm %s1733_s0, %s1089_s12  ;;  %s216_s17 = scalar_lea.vmem [#allocation2], %s1022_s13 }
  0x13   : > { %s224_s18 = sshll.u32 %s216_s17, 4  ;;  %p1515_p13 = pnand %p1227_p10, %p1487_p5  ;;  %s1519_s18 = int_to_ptr.vmem [resolvable:$true] %s224_s18 }
  0x14   : > { %s1521_s20 = scalar_lea.sflag [#allocation3], %s212_s11  ;;  %s1309_s26 = scalar_lea.hbm %s1511_s16, 2048 }
  0x15   : > { %p1310_p0 = scmp.ne.s32.totalorder %s1511_s16, %s1309_s26  ;;  %p1311_p1 = pneg %p1515_p13 }
  0x16   : > { %s1314_s7 = scalar_lea.hbm %s1733_s0, 4096  ;;  %p1315_p4 = scmp.lt.u32.totalorder %s1511_s16, %s1733_s0 }
  0x17   : > { %p1312_p2 = pnand %p1311_p1, %p1310_p0  ;;  %p1316_p5 = scmp.lt.u32.totalorder %s1314_s7, %s1309_s26 }
  0x18   : > { %p1318_p8 = scmp.lt.u32.totalorder %s1309_s26, %s1511_s16 }
  0x19   : > { %p1313_p3 = pneg %p1312_p2  ;;  %p1317_p7 = por %p1316_p5, %p1315_p4 }
  0x1b   : > { %p1319_p10 = por %p1318_p8, %p1317_p7 }
  0x1d   : > { %p1320_p9 = pnand %p1319_p10, %p1313_p3 }
  0x1f   : > { %1323 = shalt.err (!%p1320_p9)
}
  0x20   : > { %s1324_s11 = scalar_lea.vmem %s1519_s18, 2048  ;;  %s1407_s14 = smov [#allocation2]  }
  0x21   : > { %p1325_p0 = scmp.ne.s32.totalorder %s1519_s18, %s1324_s11  ;;  %s1329_s15 = sshll.u32 %s1407_s14, 4  ;;  %s1330_s15 = int_to_ptr.vmem [resolvable:$false] %s1329_s15 }
  0x22   : > { %s1331_s17 = scalar_lea.vmem %s1330_s15, 4096  ;;  %p1332_p11 = scmp.lt.s32.totalorder %s1519_s18, %s1330_s15 }
  0x23   : > { %p1327_p2 = pnand %p1325_p0, %p1311_p1  ;;  %p1333_p4 = scmp.lt.s32.totalorder %s1331_s17, %s1324_s11 }
  0x25   : > { %p1328_p12 = pneg %p1327_p2  ;;  %p1334_p5 = por %p1333_p4, %p1332_p11 }
  0x27   : > { %p1335_p7 = pnand %p1334_p5, %p1328_p12 }
  0x29   : > { %1338 = shalt.err (!%p1335_p7)
}
  0x2a   : > { %s1408_s26 = smov 128   ;;  %s1409_s28 = smov 8  }
  0x2b   : > { %1222 = dma.hbm_to_vmem [thread:$0]  (!%p1515_p13), %s1511_s16, 2048, %s1519_s18, %s1521_s20, %s1408_s26, %s1408_s26, %s1409_s28  }
  0x2c   : > { %p1026_p9 = scmp.ge.s32.totalorder %s1405_s24, 1  ;;  %p232_p1 = scmp.lt.s32.totalorder %s1405_s24, 3 }
  0x2e   : > { %p233_p3 = pnand %p1026_p9, %p232_p1 }
  0x2f   : > { %s1552_s29 = sand.u32 (!%p233_p3), 1, %s1397_s22  }
  0x30   : > { %236 = sbr.rel (%p233_p3) target bundleno = 818 (0x332), region = 44  ;;  %s1027_s7 = sshll.u32 (!%p233_p3), %s1552_s29, 7 }
  0x31   : > { %s239_s12 = scalar_lea.sflag (!%p233_p3), [#allocation3], %s1552_s29  ;;  %s1558_s13 = scalar_lea.vmem (!%p233_p3), [#allocation2], %s1027_s7 }
  0x37   : > { %1384 = dma.done.wait (%p1491_p6), %s239_s12, 2048  }
  0x38   : > { %1386 = vsyncadd (%p1491_p6), %s239_s12, 4294965248  ;;  %v1265_v0 = vld [vmem:[%s1734_s1 + $0x40] sm:$0xff]   ;;  %v1267_v2 = vld [vmem:[%s1734_s1 + $0x48] sm:$0xff]   ;;  %vm626_vm0 = vcmask 261120   ;;  %s1664_s17 = scalar_lea.vmem [#allocation5], %s1027_s7  ;;  %s1090_s7 = sshll.u32 %s1469_s25, 11 }
  0x39   : > { %v1266_v1 = vld [vmem:[%s1734_s1] sm:$0xff]   ;;  %1091 = vmatprep.subr.bf16.mxu0 %v1265_v0  ;;  %v1268_v3 = vld [vmem:[%s1734_s1 + $0x8] sm:$0xff]   ;;  %v1269_v4 = vld [vmem:[%s1734_s1 + $0x50] sm:$0xff]   ;;  %s946_s8 = sshll.u32 %s1664_s17, 4  ;;  %s1684_s12 = scalar_lea.hbm %s1739_s6, %s1090_s7  ;;  %s1686_s8 = int_to_ptr.vmem [resolvable:$true] %s946_s8 }
  0x3a   : > { %1092 = vmatpush3.bf16.msra.mxu0 %v1266_v1  ;;  %v1270_v5 = vld [vmem:[%s1734_s1 + $0x10] sm:$0xff]   ;;  %v1271_v6 = vld [vmem:[%s1734_s1 + $0x58] sm:$0xff]   ;;  %v1273_v8 = vld [vmem:[%s1734_s1 + $0x60] sm:$0xff]   ;;  %s933_s25 = scalar_lea.sflag [#allocation4], %s1552_s29  ;;  %p1746_p11 = scmp.ne.s32.totalorder %s1743_s9, 0 }
  0x3b   : > { %1093 = vmatprep.subr.bf16.mxu0 %v1267_v2  ;;  %v1272_v7 = vld [vmem:[%s1734_s1 + $0x18] sm:$0xff]   ;;  %v1274_v9 = vld [vmem:[%s1734_s1 + $0x20] sm:$0xff]   ;;  %v1275_v10 = vld [vmem:[%s1734_s1 + $0x68] sm:$0xff]   ;;  %s1410_s16 = smov [#allocation5]  }
  0x3c   : > { %v1283_v11 = vld [vmem:[%s1558_s13 + $0x4] ss:$8 sps:$4 sm:$0xff]   ;;  %v1277_v13 = vld [vmem:[%s1734_s1 + $0x70] sm:$0xff]   ;;  %v1279_v15 = vld [vmem:[%s1734_s1 + $0x78] sm:$0xff]   ;;  %s1343_s18 = sshll.u32 %s1410_s16, 4  ;;  %s1344_s18 = int_to_ptr.vmem [resolvable:$false] %s1343_s18 }
  0x3d   : > { %v1276_v12 = vld [vmem:[%s1734_s1 + $0x28] sm:$0xff]   ;;  %530 = vmatprep.mubr.bf16.mxu0 %v1283_v11  ;;  %v1278_v14 = vld [vmem:[%s1734_s1 + $0x30] sm:$0xff]   ;;  %v1280_v16 = vld [vmem:[%s1734_s1 + $0x38] sm:$0xff]   ;;  %s1345_s19 = scalar_lea.vmem %s1344_s18, 4096  ;;  %p1346_p8 = scmp.lt.s32.totalorder %s1686_s8, %s1344_s18 }
  0x3e   : > { %1094 = vmatpush3.bf16.msra.mxu0 %v1268_v3  ;;  %v1281_v17 = vld [vmem:[%s1558_s13] ss:$8 sps:$4 sm:$0xff]   ;;  %v1284_v18 = vld [vmem:[%s1558_s13 + $0x14] ss:$8 sps:$4 sm:$0xff]   ;;  %v1286_v19 = vld [vmem:[%s1558_s13 + $0x10] ss:$8 sps:$4 sm:$0xff]  }
  0x3f   : > { %1095 = vmatprep.subr.bf16.mxu0 %v1269_v4  ;;  %v1287_v20 = vld [vmem:[%s1558_s13 + $0x24] ss:$8 sps:$4 sm:$0xff]   ;;  %v1289_v21 = vld [vmem:[%s1558_s13 + $0x20] ss:$8 sps:$4 sm:$0xff]   ;;  %v1290_v22 = vld [vmem:[%s1558_s13 + $0x34] ss:$8 sps:$4 sm:$0xff]  }
  0x40   : > { %v1292_v23 = vld [vmem:[%s1558_s13 + $0x30] ss:$8 sps:$4 sm:$0xff]   ;;  %v1293_v24 = vld [vmem:[%s1558_s13 + $0x44] ss:$8 sps:$4 sm:$0xff]   ;;  %v1295_v25 = vld [vmem:[%s1558_s13 + $0x40] ss:$8 sps:$4 sm:$0xff]  }
  0x41   : > { %v1296_v26 = vld [vmem:[%s1558_s13 + $0x54] ss:$8 sps:$4 sm:$0xff]   ;;  %v1298_v27 = vld [vmem:[%s1558_s13 + $0x50] ss:$8 sps:$4 sm:$0xff]   ;;  %v1299_v28 = vld [vmem:[%s1558_s13 + $0x64] ss:$8 sps:$4 sm:$0xff]  }
  0x42   : > { %1096 = vmatpush3.bf16.msra.mxu0 %v1270_v5  ;;  %v1301_v29 = vld [vmem:[%s1558_s13 + $0x60] ss:$8 sps:$4 sm:$0xff]   ;;  %v1302_v30 = vld [vmem:[%s1558_s13 + $0x74] ss:$8 sps:$4 sm:$0xff]   ;;  %v1304_v31 = vld [vmem:[%s1558_s13 + $0x70] ss:$8 sps:$4 sm:$0xff]  }
  0x43   : > { %1097 = vmatprep.subr.bf16.mxu0 %v1271_v6  ;;  %v1305_v32 = vld [vmem:[%s1735_s2] sm:$0xff]   ;;  %v1306_v33 = vld [vmem:[%s1735_s2 + $0x8] sm:$0xff]   ;;  %s1339_s13 = scalar_lea.vmem %s1686_s8, 2048 }
  0x44   : > { %1175 = vmatprep.subr.bf16.mxu1 %v1305_v32  ;;  %p1340_p6 = scmp.ne.s32.totalorder %s1686_s8, %s1339_s13  ;;  %p1347_p10 = scmp.lt.s32.totalorder %s1345_s19, %s1339_s13 }
  0x45   : > { %1176 = vmatpush3.bf16.msra.mxu1 %v1305_v32 }
  0x46   : > { %1098 = vmatpush3.bf16.msra.mxu0 %v1272_v7  ;;  %1177 = vmatprep.subr.bf16.mxu1 %v1306_v33  ;;  %p1341_p12 = pnand %p1340_p6, %p1746_p11  ;;  %p1348_p0 = por %p1347_p10, %p1346_p8 }
  0x47   : > { %1099 = vmatprep.subr.bf16.mxu0 %v1273_v8 }
  0x48   : > { %p1342_p13 = pneg %p1341_p12 }
  0x49   : > { %1178 = vmatpush3.bf16.msra.mxu1 %v1306_v33 }
  0x4a   : > { %1100 = vmatpush3.bf16.msra.mxu0 %v1274_v9  ;;  %p1349_p2 = pnand %p1348_p0, %p1342_p13 }
  0x4b   : > { %1101 = vmatprep.subr.bf16.mxu0 %v1275_v10 }
  0x4e   : > { %1102 = vmatpush3.bf16.msra.mxu0 %v1276_v12 }
  0x4f   : > { %1103 = vmatprep.subr.bf16.mxu0 %v1277_v13 }
  0x52   : > { %1104 = vmatpush3.bf16.msra.mxu0 %v1278_v14 }
  0x53   : > { %1105 = vmatprep.subr.bf16.mxu0 %v1279_v15 }
  0x56   : > { %1106 = vmatpush3.bf16.msra.mxu0 %v1280_v16 }
  0x59   : > { %531 = vmatmul.mubr.bf16.vlgmr.msra.gmra.mrb[0].mxu0 %v1281_v17 }
  0x5a   : > { %538 = vmatprep.mubr.bf16.mxu0 %v1284_v18 }
  0x61   : > { %539 = vmatmul.mubr.bf16.gmra.mrb[4].mxu0 %v1286_v19 }
  0x62   : > { %546 = vmatprep.mubr.bf16.mxu0 %v1287_v20 }
  0x69   : > { %547 = vmatmul.mubr.bf16.gmra.mrb[8].mxu0 %v1289_v21 }
  0x6a   : > { %554 = vmatprep.mubr.bf16.mxu0 %v1290_v22 }
  0x71   : > { %555 = vmatmul.mubr.bf16.gmra.mrb[12].mxu0 %v1292_v23 }
  0x72   : > { %562 = vmatprep.mubr.bf16.mxu0 %v1293_v24 }
  0x79   : > { %563 = vmatmul.mubr.bf16.gmra.mrb[16].mxu0 %v1295_v25 }
  0x7a   : > { %570 = vmatprep.mubr.bf16.mxu0 %v1296_v26  ;;  %v1307_v26 = vld [vmem:[%s1737_s4] sm:$0xff]  }
  0x7b   : > { %1195 = vmatprep.subr.bf16.mxu1 %v1307_v26 }
  0x81   : > { %571 = vmatmul.mubr.bf16.gmra.mrb[20].mxu0 %v1298_v27  ;;  %v1308_v27 = vld [vmem:[%s1737_s4 + $0x8] sm:$0xff]  }
  0x82   : > { %578 = vmatprep.mubr.bf16.mxu0 %v1299_v28  ;;  %v1061_v28 = vld [vmem:[%s1736_s3] ss:$0 sm:$0xff] }
  0x89   : > { %579 = vmatmul.mubr.bf16.gmra.mrb[24].mxu0 %v1301_v29 }
  0x8a   : > { %586 = vmatprep.mubr.bf16.mxu0 %v1302_v30 }
  0x91   : > { %587 = vmatmul.mubr.bf16.gmra.mrb[28].mxu0 %v1304_v31 }
 0x12c   : > { %v1107_v34 = vpop.f32.mrb[0].mxu0 }
 0x12d   : > { %v1108_v35 = vpop.f32.mrb[1].mxu0 }
 0x12e   : > { %v1109_v36 = vadd.f32 %v1108_v35, %v1107_v34  ;;  %v1110_v37 = vpop.f32.mrb[2].mxu0 }
 0x12f   : > { %v1111_v38 = vpop.f32.mrb[3].mxu0 }
 0x130   : > { %v1112_v39 = vadd.f32 %v1111_v38, %v1110_v37 }
 0x132   : > { %v595_v40 = vpack.c.bf16 %v1112_v39, %v1109_v36 }
 0x134   : > { %v1113_v41 = vpop.f32.mrb[4].mxu0  ;;  %1179 = vmatprep.mubr.msk.bf16.mxu1 %vm626_vm0, %v595_v40 }
 0x135   : > { %v1114_v42 = vpop.f32.mrb[5].mxu0 }
 0x136   : > { %v1115_v43 = vadd.f32 %v1114_v42, %v1113_v41  ;;  %v1116_v44 = vpop.f32.mrb[6].mxu0 }
 0x137   : > { %v1117_v45 = vpop.f32.mrb[7].mxu0 }
 0x138   : > { %v1118_v46 = vadd.f32 %v1117_v45, %v1116_v44 }
 0x13a   : > { %v596_v47 = vpack.c.bf16 %v1118_v46, %v1115_v43 }
 0x13c   : > { %v1119_v48 = vpop.f32.mrb[8].mxu0  ;;  %1180 = vmatmul.mubr.msk.bf16.vlgmr.msra.gmra.mrb[0].mxu1 %vm626_vm0, %v596_v47 }
 0x13d   : > { %v1120_v49 = vpop.f32.mrb[9].mxu0  ;;  %1196 = vmatpush3.bf16.msra.mxu1 %v1307_v26 }
 0x13e   : > { %v1121_v50 = vadd.f32 %v1120_v49, %v1119_v48  ;;  %v1122_v51 = vpop.f32.mrb[10].mxu0  ;;  %1197 = vmatprep.subr.bf16.mxu1 %v1308_v27 }
 0x13f   : > { %v1123_v52 = vpop.f32.mrb[11].mxu0 }
 0x140   : > { %v1124_v53 = vadd.f32 %v1123_v52, %v1122_v51 }
 0x141   : > { %1198 = vmatpush3.bf16.msra.mxu1 %v1308_v27 }
 0x142   : > { %v597_v54 = vpack.c.bf16 %v1124_v53, %v1121_v50 }
 0x144   : > { %v1125_v55 = vpop.f32.mrb[12].mxu0  ;;  %1183 = vmatprep.mubr.msk.bf16.mxu1 %vm626_vm0, %v597_v54 }
 0x145   : > { %v1126_v56 = vpop.f32.mrb[13].mxu0 }
 0x146   : > { %v1127_v57 = vadd.f32 %v1126_v56, %v1125_v55  ;;  %v1128_v58 = vpop.f32.mrb[14].mxu0 }
 0x147   : > { %v1129_v59 = vpop.f32.mrb[15].mxu0 }
 0x148   : > { %v1130_v60 = vadd.f32 %v1129_v59, %v1128_v58 }
 0x14a   : > { %v598_v61 = vpack.c.bf16 %v1130_v60, %v1127_v57 }
 0x14c   : > { %v1131_v62 = vpop.f32.mrb[16].mxu0  ;;  %1184 = vmatmul.mubr.msk.bf16.gmra.mrb[4].mxu1 %vm626_vm0, %v598_v61 }
 0x14d   : > { %v1132_v63 = vpop.f32.mrb[17].mxu0 }
 0x14e   : > { %v1133_v0 = vadd.f32 %v1132_v63, %v1131_v62  ;;  %v1134_v1 = vpop.f32.mrb[18].mxu0 }
 0x14f   : > { %v1135_v2 = vpop.f32.mrb[19].mxu0 }
 0x150   : > { %v1136_v3 = vadd.f32 %v1135_v2, %v1134_v1 }
 0x152   : > { %v599_v4 = vpack.c.bf16 %v1136_v3, %v1133_v0 }
 0x154   : > { %v1137_v5 = vpop.f32.mrb[20].mxu0  ;;  %1187 = vmatprep.mubr.msk.bf16.mxu1 %vm626_vm0, %v599_v4 }
 0x155   : > { %v1138_v6 = vpop.f32.mrb[21].mxu0 }
 0x156   : > { %v1139_v7 = vadd.f32 %v1138_v6, %v1137_v5  ;;  %v1140_v8 = vpop.f32.mrb[22].mxu0 }
 0x157   : > { %v1141_v9 = vpop.f32.mrb[23].mxu0 }
 0x158   : > { %v1142_v10 = vadd.f32 %v1141_v9, %v1140_v8 }
 0x15a   : > { %v600_v11 = vpack.c.bf16 %v1142_v10, %v1139_v7 }
 0x15c   : > { %v1143_v12 = vpop.f32.mrb[24].mxu0  ;;  %1188 = vmatmul.mubr.msk.bf16.gmra.mrb[8].mxu1 %vm626_vm0, %v600_v11 }
 0x15d   : > { %v1144_v13 = vpop.f32.mrb[25].mxu0 }
 0x15e   : > { %v1145_v14 = vadd.f32 %v1144_v13, %v1143_v12  ;;  %v1146_v15 = vpop.f32.mrb[26].mxu0 }
 0x15f   : > { %v1147_v16 = vpop.f32.mrb[27].mxu0 }
 0x160   : > { %v1148_v17 = vadd.f32 %v1147_v16, %v1146_v15 }
 0x162   : > { %v601_v18 = vpack.c.bf16 %v1148_v17, %v1145_v14 }
 0x164   : > { %v1149_v19 = vpop.f32.mrb[28].mxu0  ;;  %1191 = vmatprep.mubr.msk.bf16.mxu1 %vm626_vm0, %v601_v18 }
 0x165   : > { %v1150_v20 = vpop.f32.mrb[29].mxu0 }
 0x166   : > { %v1151_v21 = vadd.f32 %v1150_v20, %v1149_v19  ;;  %v1152_v22 = vpop.f32.mrb[30].mxu0 }
 0x167   : > { %v1153_v23 = vpop.f32.mrb[31].mxu0 }
 0x168   : > { %v1154_v24 = vadd.f32 %v1153_v23, %v1152_v22 }
 0x16a   : > { %v602_v25 = vpack.c.bf16 %v1154_v24, %v1151_v21  ;;  %v1072_v21 = vld [vmem:[%s1738_s5] ss:$0 sm:$0xff] }
 0x16c   : > { %1192 = vmatmul.mubr.msk.bf16.gmra.mrb[12].mxu1 %vm626_vm0, %v602_v25 }
 0x20f   : > { %v1181_v29 = vpop.f32.mrb[0].mxu1 }
 0x210   : > { %v694_v30 = vadd.f32 %v1181_v29, %v1061_v28  ;;  %v685_v31 = vpop.f32.mrb[1].mxu1 }
 0x211   : > { %v686_v32 = vadd.f32 %v1061_v28, %v685_v31  ;;  %v1182_v33 = vpop.f32.mrb[2].mxu1 }
 0x212   : > { %v697_v34 = vadd.f32 %v1182_v33, %v1061_v28  ;;  %v688_v35 = vpop.f32.mrb[3].mxu1  ;;  %v750_v37 = vmax.f32 %v694_v30, 0.0 }
 0x213   : > { %v689_v36 = vadd.f32 %v1061_v28, %v688_v35  ;;  %v748_v39 = vmax.f32 %v686_v32, 0.0 }
 0x214   : > { %v751_v38 = vmax.f32 %v697_v34, 0.0 }
 0x215   : > { %v749_v40 = vmax.f32 %v689_v36, 0.0 }
 0x216   : > { %v765_v41 = vpack.c.bf16 %v751_v38, %v750_v37 }
 0x217   : > { %v764_v42 = vpack.c.bf16 %v749_v40, %v748_v39 }
 0x219   : > { %1199 = vmatprep.mubr.msk.bf16.mxu1 %vm626_vm0, %v764_v42 }
 0x21a   : > { %1200 = vmatmul.mubr.msk.bf16.vlgmr.msra.gmra.mrb[16].mxu1 %vm626_vm0, %v765_v41 }
 0x21f   : > { %v1185_v43 = vpop.f32.mrb[4].mxu1 }
 0x220   : > { %v710_v44 = vadd.f32 %v1185_v43, %v1061_v28  ;;  %v701_v45 = vpop.f32.mrb[5].mxu1 }
 0x221   : > { %v702_v46 = vadd.f32 %v1061_v28, %v701_v45  ;;  %v1186_v47 = vpop.f32.mrb[6].mxu1 }
 0x222   : > { %v713_v48 = vadd.f32 %v1186_v47, %v1061_v28  ;;  %v704_v49 = vpop.f32.mrb[7].mxu1  ;;  %v754_v51 = vmax.f32 %v710_v44, 0.0 }
 0x223   : > { %v705_v50 = vadd.f32 %v1061_v28, %v704_v49  ;;  %v752_v53 = vmax.f32 %v702_v46, 0.0 }
 0x224   : > { %v755_v52 = vmax.f32 %v713_v48, 0.0 }
 0x225   : > { %v753_v54 = vmax.f32 %v705_v50, 0.0 }
 0x226   : > { %v767_v55 = vpack.c.bf16 %v755_v52, %v754_v51 }
 0x227   : > { %v766_v56 = vpack.c.bf16 %v753_v54, %v752_v53 }
 0x229   : > { %1203 = vmatprep.mubr.msk.bf16.mxu1 %vm626_vm0, %v766_v56 }
 0x22a   : > { %1204 = vmatmul.mubr.msk.bf16.gmra.mrb[20].mxu1 %vm626_vm0, %v767_v55 }
 0x22f   : > { %v1189_v57 = vpop.f32.mrb[8].mxu1 }
 0x230   : > { %v726_v58 = vadd.f32 %v1189_v57, %v1061_v28  ;;  %v717_v59 = vpop.f32.mrb[9].mxu1 }
 0x231   : > { %v718_v60 = vadd.f32 %v1061_v28, %v717_v59  ;;  %v1190_v61 = vpop.f32.mrb[10].mxu1 }
 0x232   : > { %v729_v62 = vadd.f32 %v1190_v61, %v1061_v28  ;;  %v720_v63 = vpop.f32.mrb[11].mxu1  ;;  %v758_v1 = vmax.f32 %v726_v58, 0.0 }
 0x233   : > { %v721_v0 = vadd.f32 %v1061_v28, %v720_v63  ;;  %v756_v3 = vmax.f32 %v718_v60, 0.0 }
 0x234   : > { %v759_v2 = vmax.f32 %v729_v62, 0.0 }
 0x235   : > { %v757_v4 = vmax.f32 %v721_v0, 0.0 }
 0x236   : > { %v769_v5 = vpack.c.bf16 %v759_v2, %v758_v1 }
 0x237   : > { %v768_v6 = vpack.c.bf16 %v757_v4, %v756_v3 }
 0x239   : > { %1207 = vmatprep.mubr.msk.bf16.mxu1 %vm626_vm0, %v768_v6 }
 0x23a   : > { %1208 = vmatmul.mubr.msk.bf16.gmra.mrb[24].mxu1 %vm626_vm0, %v769_v5 }
 0x23f   : > { %v1193_v7 = vpop.f32.mrb[12].mxu1 }
 0x240   : > { %v742_v8 = vadd.f32 %v1193_v7, %v1061_v28  ;;  %v733_v9 = vpop.f32.mrb[13].mxu1 }
 0x241   : > { %v734_v10 = vadd.f32 %v1061_v28, %v733_v9  ;;  %v1194_v11 = vpop.f32.mrb[14].mxu1 }
 0x242   : > { %v745_v12 = vadd.f32 %v1194_v11, %v1061_v28  ;;  %v736_v13 = vpop.f32.mrb[15].mxu1  ;;  %v762_v15 = vmax.f32 %v742_v8, 0.0 }
 0x243   : > { %v737_v14 = vadd.f32 %v1061_v28, %v736_v13  ;;  %v760_v17 = vmax.f32 %v734_v10, 0.0 }
 0x244   : > { %v763_v16 = vmax.f32 %v745_v12, 0.0 }
 0x245   : > { %v761_v18 = vmax.f32 %v737_v14, 0.0 }
 0x246   : > { %v771_v19 = vpack.c.bf16 %v763_v16, %v762_v15 }
 0x247   : > { %v770_v20 = vpack.c.bf16 %v761_v18, %v760_v17 }
 0x249   : > { %1211 = vmatprep.mubr.msk.bf16.mxu1 %vm626_vm0, %v770_v20 }
 0x24a   : > { %1212 = vmatmul.mubr.msk.bf16.gmra.mrb[28].mxu1 %vm626_vm0, %v771_v19 }
 0x2ed   : > { %v1201_v22 = vpop.f32.mrb[16].mxu1 }
 0x2ee   : > { %v862_v23 = vadd.f32 %v1201_v22, %v1072_v21  ;;  %v853_v24 = vpop.f32.mrb[17].mxu1 }
 0x2ef   : > { %v854_v25 = vadd.f32 %v1072_v21, %v853_v24  ;;  %v1202_v26 = vpop.f32.mrb[18].mxu1 }
 0x2f0   : > { %918 = vst [vmem:[%s1664_s17 + $0x10] sm:$0xff] %v862_v23  ;;  %v865_v27 = vadd.f32 %v1202_v26, %v1072_v21  ;;  %v856_v28 = vpop.f32.mrb[19].mxu1 }
 0x2f1   : > { %916 = vst [vmem:[%s1664_s17] sm:$0xff] %v854_v25  ;;  %v857_v29 = vadd.f32 %v1072_v21, %v856_v28 }
 0x2f2   : > { %919 = vst [vmem:[%s1664_s17 + $0x18] sm:$0xff] %v865_v27 }
 0x2f3   : > { %917 = vst [vmem:[%s1664_s17 + $0x8] sm:$0xff] %v857_v29 }
 0x2fd   : > { %v1205_v30 = vpop.f32.mrb[20].mxu1 }
 0x2fe   : > { %v878_v31 = vadd.f32 %v1205_v30, %v1072_v21  ;;  %v869_v32 = vpop.f32.mrb[21].mxu1 }
 0x2ff   : > { %v870_v33 = vadd.f32 %v1072_v21, %v869_v32  ;;  %v1206_v34 = vpop.f32.mrb[22].mxu1 }
 0x300   : > { %922 = vst [vmem:[%s1664_s17 + $0x30] sm:$0xff] %v878_v31  ;;  %v881_v35 = vadd.f32 %v1206_v34, %v1072_v21  ;;  %v872_v36 = vpop.f32.mrb[23].mxu1 }
 0x301   : > { %920 = vst [vmem:[%s1664_s17 + $0x20] sm:$0xff] %v870_v33  ;;  %v873_v37 = vadd.f32 %v1072_v21, %v872_v36 }
 0x302   : > { %923 = vst [vmem:[%s1664_s17 + $0x38] sm:$0xff] %v881_v35 }
 0x303   : > { %921 = vst [vmem:[%s1664_s17 + $0x28] sm:$0xff] %v873_v37 }
 0x30d   : > { %v1209_v38 = vpop.f32.mrb[24].mxu1 }
 0x30e   : > { %v894_v39 = vadd.f32 %v1209_v38, %v1072_v21  ;;  %v885_v40 = vpop.f32.mrb[25].mxu1 }
 0x30f   : > { %v886_v41 = vadd.f32 %v1072_v21, %v885_v40  ;;  %v1210_v42 = vpop.f32.mrb[26].mxu1 }
 0x310   : > { %926 = vst [vmem:[%s1664_s17 + $0x50] sm:$0xff] %v894_v39  ;;  %v897_v43 = vadd.f32 %v1210_v42, %v1072_v21  ;;  %v888_v44 = vpop.f32.mrb[27].mxu1 }
 0x311   : > { %924 = vst [vmem:[%s1664_s17 + $0x40] sm:$0xff] %v886_v41  ;;  %v889_v45 = vadd.f32 %v1072_v21, %v888_v44 }
 0x312   : > { %927 = vst [vmem:[%s1664_s17 + $0x58] sm:$0xff] %v897_v43 }
 0x313   : > { %925 = vst [vmem:[%s1664_s17 + $0x48] sm:$0xff] %v889_v45 }
 0x31d   : > { %v1213_v46 = vpop.f32.mrb[28].mxu1 }
 0x31e   : > { %v910_v47 = vadd.f32 %v1213_v46, %v1072_v21  ;;  %v901_v48 = vpop.f32.mrb[29].mxu1 }
 0x31f   : > { %v902_v49 = vadd.f32 %v1072_v21, %v901_v48  ;;  %v1214_v50 = vpop.f32.mrb[30].mxu1 }
 0x320   : > { %930 = vst [vmem:[%s1664_s17 + $0x70] sm:$0xff] %v910_v47  ;;  %v913_v51 = vadd.f32 %v1214_v50, %v1072_v21  ;;  %v904_v52 = vpop.f32.mrb[31].mxu1 }
 0x321   : > { %928 = vst [vmem:[%s1664_s17 + $0x60] sm:$0xff] %v902_v49  ;;  %v905_v53 = vadd.f32 %v1072_v21, %v904_v52 }
 0x322   : > { %931 = vst [vmem:[%s1664_s17 + $0x78] sm:$0xff] %v913_v51 }
 0x323   : > { %929 = vst [vmem:[%s1664_s17 + $0x68] sm:$0xff] %v905_v53 }
 0x324   : > { %1352 = shalt.err (!%p1349_p2)
}
 0x325   : > { %s1353_s20 = scalar_lea.hbm %s1684_s12, 2048  ;;  %s1357_s15 = scalar_lea.hbm %s1739_s6, 4096 }
 0x326   : > { %p1354_p4 = scmp.ne.s32.totalorder %s1684_s12, %s1353_s20  ;;  %p1358_p9 = scmp.lt.u32.totalorder %s1684_s12, %s1739_s6 }
 0x327   : > { %p1359_p1 = scmp.lt.u32.totalorder %s1357_s15, %s1353_s20  ;;  %p1361_p6 = scmp.lt.u32.totalorder %s1353_s20, %s1684_s12 }
 0x328   : > { %p1355_p5 = pnand %p1354_p4, %p1746_p11 }
 0x329   : > { %p1360_p3 = por %p1359_p1, %p1358_p9 }
 0x32a   : > { %p1356_p7 = pneg %p1355_p5 }
 0x32b   : > { %p1362_p12 = por %p1361_p6, %p1360_p3 }
 0x32d   : > { %p1363_p13 = pnand %p1362_p12, %p1356_p7 }
 0x32f   : > { %1366 = shalt.err (!%p1363_p13)
}
 0x330   : > { %s1411_s26 = smov 128   ;;  %s1412_s28 = smov 8  }
 0x331   : > { %1217 = dma.vmem_to_hbm [thread:$0]  (%p1746_p11), %s1686_s8, 2048, %s1684_s12, %s933_s25, %s1411_s26, %s1411_s26, %s1412_s28  }
 0x332 PF: > { %s961_s13 = sand.u32 1, %s1393_s21   ;;  %p1747_p8 = scmp.ne.s32.totalorder %s1744_s10, 0 }
 0x333   : > { %p1748_p10 = scmp.ge.s32.totalorder %s1405_s24, 2  ;;  %s962_s16 = scalar_lea.sflag [#allocation4], %s961_s13 }
 0x335   : > { %p1224_p0 = pnand %p1748_p10, %p1747_p8 }
 0x337   : > { %1388 = dma.done.wait (!%p1224_p0), %s962_s16, 2048  }
 0x338   : > { %1390 = vsyncadd (!%p1224_p0), %s962_s16, 4294965248  ;;  %p19_p2 = scmp.ge.s32.totalorder %s1473_s27, 4   ;;  %s1749_s21 = smov %s1397_s22 }
 0x339   : > { %s1750_s22 = smov %s1401_s23  ;;  %s1751_s23 = smov %s1485_s30 }
 0x33a   : > { %s1752_s24 = smov %s1473_s27  ;;  %21 = sbr.rel (!%p19_p2) target bundleno = 5 (0x5), region = 89 }
 0x341   :  { %967 = vsyncpa [#allocation3], 1 }
 0x342   :  { %969 = vsyncpa [#allocation3 + $0x1], 1 }
 0x343   :  { %970 = vsyncpa [#allocation4], 1 }
 0x344   :  { %972 = vsyncpa [#allocation4 + $0x1], 1 }

</bundles_post_ra>
